<compile_context>
chip_gen: v7x
topology: tpu7x:2x2x1
jax: 0.10.0
libtpu: 0.0.40
codegen_flags: <defaults>
</compile_context>

<pallas_src>
import functools

import jax
import jax.numpy as jnp
from jax import lax
from jax.experimental import pallas as pl
from jax.experimental.pallas import tpu as pltpu


LANES = 128
DEFAULT_TILE_BYTES = 4 << 20       # ~4 MiB per input pipeline buffer
VMEM_LIMIT_BYTES = 48 << 20        # < 64 MiB physical on v7x; ample on v5e/v6e
_SUBLANES_BY_ITEMSIZE = {4: 8, 2: 16, 1: 32}   # native sublane tile per dtype width


def _tensorcores_per_chip():
    """TensorCores a single kernel can shard a "parallel" grid axis across
    (2 on v7x-style megacore chips, 1 on v5e/v6e).  Defensive: unknown -> 1."""
    try:
        info = pltpu.get_tpu_info()
    except Exception:
        return 1
    for attr in ("num_tensorcores", "tensorcore_count", "num_cores",
                 "core_count", "cores_per_chip", "tensorcores_per_chip"):
        v = getattr(info, attr, None)
        if isinstance(v, int) and v >= 1:
            return min(v, 2)
    return 1


def _sq_diff_partial_kernel(x_ref, y_ref, out_ref, *,
                            tiles_per_part, tile_rows, total_rows, need_mask):
    """Accumulate per-lane sums of (x - y)^2 for one part of the row-tile grid.

    x_ref/y_ref: (tile_rows, 128) blocks in VMEM (native input dtype).
    out_ref:     (1, 8, 128) f32 block, resident across the reduction axis;
                 holds this part's running (8, 128) partial sums.
    """
    i = pl.program_id(1)   # reduction ("arbitrary") axis within this part

    @pl.when(i == 0)
    def _init():
        out_ref[...] = jnp.zeros_like(out_ref)

    # Cast in-kernel: HBM traffic stays at the native dtype, accumulate in f32.
    d = x_ref[...].astype(jnp.float32) - y_ref[...].astype(jnp.float32)
    sq = d * d

    def _accumulate(v):
        # (tile_rows, 128) -> (tile_rows//8, 8, 128) is vreg-aligned (no data
        # movement); sum over the leading dim is pure VPU accumulation across
        # vregs -> (8, 128) partial added to the resident output block.
        out_ref[...] += v.reshape(tile_rows // 8, 8, LANES).sum(axis=0)[None]

    if need_mask:
        c = pl.program_id(0)
        row_start = (c * tiles_per_part + i) * tile_rows
        in_bounds = row_start + tile_rows <= total_rows

        @pl.when(in_bounds)
        def _full_tile():
            _accumulate(sq)

        @pl.when(jnp.logical_not(in_bounds))
        def _ragged_or_duplicate_tile():
            # Mask rows past the end of the array: the ragged last tile and
            # any clamped duplicate tile (uneven split across parts).
            row_ids = lax.broadcasted_iota(jnp.int32, sq.shape, 0) + row_start
            _accumulate(jnp.where(row_ids < total_rows, sq, 0.0))
    else:
        _accumulate(sq)


def _pallas_sq_diff_sum(x2d, y2d, *, tile_rows=None, parts=None,
                        vmem_limit_bytes=VMEM_LIMIT_BYTES):
    """Sum of squared differences over a (rows, 128) slab via a tiled kernel."""
    rows, lanes = x2d.shape
    assert lanes == LANES
    assert x2d.dtype == y2d.dtype

    itemsize = jnp.dtype(x2d.dtype).itemsize
    sub = _SUBLANES_BY_ITEMSIZE.get(itemsize, 8)
    assert rows >= sub

    # Tile sizing: target ~DEFAULT_TILE_BYTES per input buffer, rounded down to
    # the dtype's native sublane tile, never larger than the array, and capped
    # so 2 inputs x 2 pipeline buffers stay well inside the VMEM limit.
    if tile_rows is None:
        tile_rows = DEFAULT_TILE_BYTES // (LANES * itemsize)
    max_tile_rows = (vmem_limit_bytes - (8 << 20)) // (4 * LANES * itemsize)
    tile_rows = min(tile_rows, rows, max_tile_rows)
    tile_rows = max(sub, (tile_rows // sub) * sub)

    num_tiles = pl.cdiv(rows, tile_rows)

    if parts is None:
        parts = _tensorcores_per_chip()
    parts = max(1, min(parts, num_tiles))

    tiles_per_part = pl.cdiv(num_tiles, parts)
    need_mask = (parts * tiles_per_part != num_tiles) or (num_tiles * tile_rows != rows)

    kernel = functools.partial(
        _sq_diff_partial_kernel,
        tiles_per_part=tiles_per_part,
        tile_rows=tile_rows,
        total_rows=rows,
        need_mask=need_mask,
    )

    def in_map(c, i):
        # Clamp so the DMA'd block index is always in range; clamped duplicate
        # tiles are fully masked in-kernel via their *logical* row ids.
        return (jnp.minimum(c * tiles_per_part + i, num_tiles - 1), 0)

    n = rows * LANES
    partials = pl.pallas_call(
        kernel,
        out_shape=jax.ShapeDtypeStruct((parts, 8, LANES), jnp.float32),
        grid_spec=pltpu.PrefetchScalarGridSpec(
            num_scalar_prefetch=0,
            grid=(parts, tiles_per_part),
            in_specs=[
                pl.BlockSpec((tile_rows, LANES), in_map),
                pl.BlockSpec((tile_rows, LANES), in_map),
            ],
            out_specs=pl.BlockSpec((1, 8, LANES), lambda c, i: (c, 0, 0)),
        ),
        compiler_params=pltpu.CompilerParams(
            dimension_semantics=("parallel", "arbitrary"),
            vmem_limit_bytes=vmem_limit_bytes,
        ),
        cost_estimate=pl.CostEstimate(
            flops=3 * n,
            transcendentals=0,
            bytes_accessed=2 * n * itemsize + parts * 8 * LANES * 4,
        ),
    )(x2d, y2d)

    # Tiny combine of the per-part / per-lane partial sums (parts*8*128 elems).
    return jnp.sum(partials)


class PerceptualLoss:
    """JAX port of the abstract PerceptualLoss base class (no parameters)."""

    def __init__(self):
        self._params = []  # module registers no parameters

    def forward(self, x, y):
        raise NotImplementedError()

    def __call__(self, *args, **kwargs):
        return self.forward(*args, **kwargs)

    def _freeze_layers(self):
        # No parameters; nothing to freeze. Kept for API parity.
        for p in self._params:
            p.requires_grad = False

    def get_trainable_parameters(self):
        return [p for p in self._params if getattr(p, "requires_grad", False)]


class IdentityFeaturePerceptualLoss(PerceptualLoss):
    """Minimal concrete subclass: identity feature extractor + Pallas MSE."""

    def __init__(self, tile_rows=None, parts=None):
        super().__init__()
        self.tile_rows = tile_rows   # None -> dtype-sized ~4 MiB/buffer default
        self.parts = parts           # None -> TensorCores-per-chip

    def forward(self, x, y, tile_rows=None, parts=None):
        assert x.shape == y.shape, "x and y must have identical shapes"
        assert x.dtype == y.dtype, "x and y must have identical dtypes"
        tile_rows = self.tile_rows if tile_rows is None else tile_rows
        parts = self.parts if parts is None else parts

        n = int(x.size)
        xf = jnp.ravel(x)   # free reshape of a contiguous array; native dtype
        yf = jnp.ravel(y)

        rows = n // LANES
        tail = n - rows * LANES

        itemsize = jnp.dtype(x.dtype).itemsize
        sub = _SUBLANES_BY_ITEMSIZE.get(itemsize, 8)

        # <128-element ragged tail is folded in with a tiny jnp sum instead of
        # materializing a padded copy of both inputs.
        tail_ssd = jnp.float32(0.0)
        if tail:
            xt = xf[rows * LANES:].astype(jnp.float32)
            yt = yf[rows * LANES:].astype(jnp.float32)
            tail_ssd = jnp.sum((xt - yt) ** 2)

        if rows == 0:
            return tail_ssd / jnp.float32(n)

        if tail:
            # TODO(synk): the prefix slice may still materialize a copy when it
            # feeds the custom call; a fully copy-free ragged-lane path would
            # need a 1-D layout Mosaic does not guarantee.
            x2d = xf[:rows * LANES].reshape(rows, LANES)
            y2d = yf[:rows * LANES].reshape(rows, LANES)
        else:
            x2d = xf.reshape(rows, LANES)
            y2d = yf.reshape(rows, LANES)

        if rows < sub:
            # Truly tiny input (< sub*128 elements): a few-KiB zero pad so the
            # block meets the dtype's native (sub, 128) tile; identical zero
            # padding on x and y contributes 0 to the sum.
            x2d = jnp.pad(x2d, ((0, sub - rows), (0, 0)))
            y2d = jnp.pad(y2d, ((0, sub - rows), (0, 0)))
            rows = sub

        ssd = _pallas_sq_diff_sum(x2d, y2d, tile_rows=tile_rows, parts=parts)
        return (ssd + tail_ssd) / jnp.float32(n)


if __name__ == "__main__":
    key = jax.random.PRNGKey(0)
    kx, ky, kx2, ky2, kx3, ky3 = jax.random.split(key, 6)

    loss_mod = IdentityFeaturePerceptualLoss()

    # Small NCHW inputs consistent with an image perceptual loss.
    x = jax.random.normal(kx, (2, 4, 16, 16), dtype=jnp.float32)
    y = jax.random.normal(ky, (2, 4, 16, 16), dtype=jnp.float32)
    loss = jax.block_until_ready(loss_mod(x, y))
    ref = jnp.mean((x - y) ** 2)
    assert jnp.allclose(loss, ref, rtol=1e-4, atol=1e-6), (loss, ref)

    # Multi-tile path with a ragged last row tile and (parts=2 forced) a
    # clamped duplicate tile -- all gated/masked in-kernel via pl.when.
    x2 = jax.random.normal(kx2, (2, 8, 32, 32), dtype=jnp.float32)
    y2 = jax.random.normal(ky2, (2, 8, 32, 32), dtype=jnp.float32)
    loss2 = jax.block_until_ready(loss_mod.forward(x2, y2, tile_rows=48, parts=2))
    ref2 = jnp.mean((x2 - y2) ** 2)
    assert jnp.allclose(loss2, ref2, rtol=1e-4, atol=1e-6), (loss2, ref2)

    # Ragged lane tail (n % 128 != 0) folded in without padding the inputs,
    # plus a ragged last row tile.
    x3 = jax.random.normal(kx3, (3, 5, 7, 11), dtype=jnp.float32)
    y3 = jax.random.normal(ky3, (3, 5, 7, 11), dtype=jnp.float32)
    loss3 = jax.block_until_ready(loss_mod(x3, y3))
    ref3 = jnp.mean((x3 - y3) ** 2)
    assert jnp.allclose(loss3, ref3, rtol=1e-4, atol=1e-6), (loss3, ref3)

    # bf16 inputs: native-dtype DMA with the in-kernel f32 cast, tile rounded
    # to the 16-row bf16 sublane tile.
    xb = jax.random.normal(kx, (2, 4, 16, 16), dtype=jnp.bfloat16)
    yb = jax.random.normal(ky, (2, 4, 16, 16), dtype=jnp.bfloat16)
    lossb = jax.block_until_ready(loss_mod(xb, yb))
    refb = jnp.mean((xb.astype(jnp.float32) - yb.astype(jnp.float32)) ** 2)
    assert jnp.allclose(lossb, refb, rtol=1e-3, atol=1e-5), (lossb, refb)

    # Base class still faithfully raises NotImplementedError.
    try:
        PerceptualLoss()(x, y)
        raise AssertionError("base forward should raise NotImplementedError")
    except NotImplementedError:
        pass

    print("KERNEL_OK")
</pallas_src>

<mosaic_0001>
module attributes {stable_mosaic.version = 11 : i64} {
  func.func @_sq_diff_partial_kernel(%arg0: i32, %arg1: i32, %arg2: memref<16x128xf32, #tpu.memory_space<vmem>>, %arg3: memref<16x128xf32, #tpu.memory_space<vmem>>, %arg4: memref<1x8x128xf32, #tpu.memory_space<vmem>>) attributes {dimension_semantics = [#tpu.dimension_semantics<parallel>, #tpu.dimension_semantics<arbitrary>], iteration_bounds = array<i64: 1, 1>, scalar_prefetch = 0 : i64, scratch_operands = 0 : i64, tpu.core_type = #tpu.core_type<tc>, window_params = [{transform_indices = @transform_0, window_bounds = array<i64: 16, 128>}, {transform_indices = @transform_1, window_bounds = array<i64: 16, 128>}, {transform_indices = @transform_2, window_bounds = array<i64: 1, 8, 128>}]} {
    %c0_i32 = arith.constant 0 : i32
    %0 = arith.cmpi eq, %arg1, %c0_i32 : i32
    %1 = arith.extui %0 : i1 to i32
    %c0_i32_0 = arith.constant 0 : i32
    %2 = arith.cmpi ne, %1, %c0_i32_0 : i32
    scf.if %2 {
      %cst_10 = arith.constant 0.000000e+00 : f32
      %13 = vector.broadcast %cst_10 : f32 to vector<1x8x128xf32>
      %c0_11 = arith.constant 0 : index
      %c0_12 = arith.constant 0 : index
      %c0_13 = arith.constant 0 : index
      %14 = vector.load %arg4[%c0_11, %c0_12, %c0_13] : memref<1x8x128xf32, #tpu.memory_space<vmem>>, vector<1x8x128xf32>
      tpu.vector_store %arg4[%c0_11, %c0_12, %c0_13], %13 {strides = array<i32>} : memref<1x8x128xf32, #tpu.memory_space<vmem>>, vector<1x8x128xf32>,
    } else {
    }
    %c0 = arith.constant 0 : index
    %c0_1 = arith.constant 0 : index
    %3 = vector.load %arg2[%c0, %c0_1] : memref<16x128xf32, #tpu.memory_space<vmem>>, vector<16x128xf32>
    %c0_2 = arith.constant 0 : index
    %c0_3 = arith.constant 0 : index
    %4 = vector.load %arg3[%c0_2, %c0_3] : memref<16x128xf32, #tpu.memory_space<vmem>>, vector<16x128xf32>
    %5 = arith.subf %3, %4 : vector<16x128xf32>
    %6 = arith.mulf %5, %5 : vector<16x128xf32>
    %c0_4 = arith.constant 0 : index
    %c0_5 = arith.constant 0 : index
    %c0_6 = arith.constant 0 : index
    %7 = vector.load %arg4[%c0_4, %c0_5, %c0_6] : memref<1x8x128xf32, #tpu.memory_space<vmem>>, vector<1x8x128xf32>
    %8 = vector.shape_cast %6 : vector<16x128xf32> to vector<2x8x128xf32>
    %cst = arith.constant dense<0.000000e+00> : vector<8x128xf32>
    %9 = vector.multi_reduction <add>, %8, %cst [0] : vector<2x8x128xf32> to vector<8x128xf32>
    %10 = vector.shape_cast %9 : vector<8x128xf32> to vector<1x8x128xf32>
    %11 = arith.addf %7, %10 : vector<1x8x128xf32>
    %c0_7 = arith.constant 0 : index
    %c0_8 = arith.constant 0 : index
    %c0_9 = arith.constant 0 : index
    %12 = vector.load %arg4[%c0_7, %c0_8, %c0_9] : memref<1x8x128xf32, #tpu.memory_space<vmem>>, vector<1x8x128xf32>
    tpu.vector_store %arg4[%c0_7, %c0_8, %c0_9], %11 {strides = array<i32>} : memref<1x8x128xf32, #tpu.memory_space<vmem>>, vector<1x8x128xf32>,
    return
  }
  func.func @transform_0(%arg0: i32, %arg1: i32) -> (i32, i32) {
    %c1_i32 = arith.constant 1 : i32
    %0 = arith.muli %arg0, %c1_i32 : i32
    %1 = arith.addi %0, %arg1 : i32
    %c0_i32 = arith.constant 0 : i32
    %2 = arith.minsi %1, %c0_i32 : i32
    %c0_i32_0 = arith.constant 0 : i32
    %c0_i32_1 = arith.constant 0 : i32
    return %2, %c0_i32_0 : i32, i32
  }
  func.func @transform_1(%arg0: i32, %arg1: i32) -> (i32, i32) {
    %c1_i32 = arith.constant 1 : i32
    %0 = arith.muli %arg0, %c1_i32 : i32
    %1 = arith.addi %0, %arg1 : i32
    %c0_i32 = arith.constant 0 : i32
    %2 = arith.minsi %1, %c0_i32 : i32
    %c0_i32_0 = arith.constant 0 : i32
    %c0_i32_1 = arith.constant 0 : i32
    return %2, %c0_i32_0 : i32, i32
  }
  func.func @transform_2(%arg0: i32, %arg1: i32) -> (i32, i32, i32) {
    %c0_i32 = arith.constant 0 : i32
    %c0_i32_0 = arith.constant 0 : i32
    %c0_i32_1 = arith.constant 0 : i32
    return %arg0, %c0_i32, %c0_i32_0 : i32, i32, i32
  }
}

</mosaic_0001>

<bundles_post_ra>
// kernel: tpu_custom_call.1
= control target key start
LH: loop header
LB: loop body
LE: loop exit
PB: predicated region body
PF: predicated region fallthrough
CT: control target
= control target key end

     0   :  { %7 = vsyncpa [#allocation3], 0  ;;  %s231_s0 = inlined_call_operand.hbm [shape: f32[16,128], index: 0, kind: input, shape index: {}]   ;;  %s232_s1 = inlined_call_operand.hbm [shape: f32[16,128], index: 1, kind: input, shape index: {}]   ;;  %s233_s2 = inlined_call_operand.hbm [shape: f32[1,8,128], index: 2, kind: output, shape index: {}]  }
   0x1   :  { %8 = vsyncpa [#allocation6], 0 }
   0x2   :  { %9 = vsyncpa [#allocation4], 0  ;;  %s175_s9 = smov [#allocation2]   ;;  %s103_s13 = scalar_lea.hbm %s231_s0, 256 }
   0x3   :  { %s21_s10 = sshll.u32 %s175_s9, 4  ;;  %p104_p0 = scmp.ne.s32.totalorder %s231_s0, %s103_s13  ;;  %s22_s10 = int_to_ptr.vmem [resolvable:$true] %s21_s10 }
   0x4   :  { %p107_p1 = scmp.lt.u32.totalorder %s103_s13, %s231_s0 }
   0x6   :  { %p109_p2 = pnand %p107_p1, %p104_p0 }
   0x8   :  { %112 = shalt.err (!%p109_p2)
}
   0x9   :  { %s113_s18 = scalar_lea.vmem %s22_s10, 256  ;;  %p118_p4 = scmp.lt.s32.totalorder %s22_s10, %s22_s10 }
   0xa   :  { %p114_p3 = scmp.ne.s32.totalorder %s22_s10, %s113_s18  ;;  %p119_p5 = scmp.lt.s32.totalorder %s113_s18, %s113_s18 }
   0xc   :  { %p120_p6 = por %p119_p5, %p118_p4 }
   0xe   :  { %p121_p7 = pnand %p120_p6, %p114_p3 }
  0x10   :  { %124 = shalt.err (!%p121_p7)
}
  0x11   :  { %s176_s19 = smov 128   ;;  %s177_s20 = smov 8  }
  0x12   :  { %27 = dma.hbm_to_vmem [thread:$0]  %s231_s0, 256, %s22_s10, [#allocation3], %s176_s19, %s176_s19, %s177_s20  }
  0x13   :  { %s178_s23 = smov [#allocation5]   ;;  %s125_s27 = scalar_lea.hbm %s232_s1, 256 }
  0x14   :  { %s39_s24 = sshll.u32 %s178_s23, 4  ;;  %p126_p8 = scmp.ne.s32.totalorder %s232_s1, %s125_s27  ;;  %s40_s24 = int_to_ptr.vmem [resolvable:$true] %s39_s24 }
  0x15   :  { %p129_p9 = scmp.lt.u32.totalorder %s125_s27, %s232_s1 }
  0x17   :  { %p131_p10 = pnand %p129_p9, %p126_p8 }
  0x19   :  { %134 = shalt.err (!%p131_p10)
}
  0x1a   :  { %s135_s4 = scalar_lea.vmem %s40_s24, 256  ;;  %p140_p12 = scmp.lt.s32.totalorder %s40_s24, %s40_s24 }
  0x1b   :  { %p136_p11 = scmp.ne.s32.totalorder %s40_s24, %s135_s4  ;;  %p141_p13 = scmp.lt.s32.totalorder %s135_s4, %s135_s4 }
  0x1d   :  { %p142_p0 = por %p141_p13, %p140_p12 }
  0x1f   :  { %p143_p1 = pnand %p142_p0, %p136_p11 }
  0x21   :  { %146 = shalt.err (!%p143_p1)
}
  0x22   :  { %45 = dma.hbm_to_vmem [thread:$0]  %s232_s1, 256, %s40_s24, [#allocation6], %s176_s19, %s176_s19, %s177_s20  }
  0x23   :  { %169 = dma.done.wait [#allocation3], 256  }
  0x24   :  { %170 = vsyncadd [#allocation3], 4294967040 }
  0x25   :  { %171 = dma.done.wait [#allocation6], 256  }
  0x26   :  { %172 = vsyncadd [#allocation6], 4294967040  ;;  %v65_v0 = vld [vmem:[#allocation2] sm:$0xff]  ;;  %v66_v1 = vld [vmem:[#allocation2 + $0x8] sm:$0xff]  ;;  %s179_s6 = smov [#allocation7]  }
  0x27   :  { %v67_v2 = vld [vmem:[#allocation5] sm:$0xff]  ;;  %v68_v3 = vld [vmem:[#allocation5 + $0x8] sm:$0xff]  ;;  %s83_s7 = sshll.u32 %s179_s6, 4  ;;  %s84_s7 = int_to_ptr.vmem [resolvable:$true] %s83_s7 }
  0x28   :  { %v69_v4 = vsub.f32 %v65_v0, %v67_v2  ;;  %v70_v5 = vsub.f32 %v66_v1, %v68_v3  ;;  %s147_s8 = scalar_lea.vmem %s84_s7, 128  ;;  %p152_p3 = scmp.lt.s32.totalorder %s84_s7, %s84_s7 }
  0x29   :  { %p148_p2 = scmp.ne.s32.totalorder %s84_s7, %s147_s8  ;;  %p153_p4 = scmp.lt.s32.totalorder %s147_s8, %s147_s8 }
  0x2a   :  { %v71_v6 = vmul.f32 %v69_v4, %v69_v4  ;;  %v72_v7 = vmul.f32 %v70_v5, %v70_v5 }
  0x2b   :  { %p154_p5 = por %p153_p4, %p152_p3 }
  0x2c   :  { %v74_v8 = vadd.f32 %v72_v7, %v71_v6 }
  0x2d   :  { %p155_p6 = pnand %p154_p5, %p148_p2 }
  0x2e   :  { %76 = vst [vmem:[#allocation7] sm:$0xff] %v74_v8 }
  0x2f   :  { %158 = shalt.err (!%p155_p6)
}
  0x30   :  { %s159_s10 = scalar_lea.hbm %s233_s2, 128 }
  0x31   :  { %p160_p7 = scmp.ne.s32.totalorder %s233_s2, %s159_s10  ;;  %p163_p8 = scmp.lt.u32.totalorder %s159_s10, %s233_s2 }
  0x33   :  { %p165_p9 = pnand %p163_p8, %p160_p7 }
  0x35   :  { %168 = shalt.err (!%p165_p9)
}
  0x36   :  { %86 = dma.vmem_to_hbm [thread:$0]  %s84_s7, 128, %s233_s2, [#allocation4]  }
  0x37   :  { %173 = dma.done.wait [#allocation4], 128  }
  0x38   :  { %174 = vsyncadd [#allocation4], 4294967168 }
  0x39   :  { %90 = vsyncpa [#allocation3], 1 }
  0x3a   :  { %91 = vsyncpa [#allocation6], 1 }
  0x3b   :  { %92 = vsyncpa [#allocation4], 1 }

</bundles_post_ra>
